<compile_context>
chip_gen: v6e
topology: v6e:2x2x1
jax: 0.10.0
libtpu: 0.0.40
codegen_flags: <defaults>
</compile_context>

<pallas_src>
import functools

import jax
import jax.numpy as jnp
from jax.experimental import pallas as pl
from jax.experimental.pallas import tpu as pltpu


def _round_up(x, m):
    return ((x + m - 1) // m) * m


def _tpu_generation_params():
    """Return (vmem_capacity_bytes, min_grid_steps) for the local TPU."""
    kind = ""
    try:
        kind = jax.devices()[0].device_kind.lower().replace(" ", "")
    except Exception:
        pass
    if "v7" in kind or "tpu7" in kind:
        vmem_cap = 64 * 1024 * 1024      # v7x: 64 MiB VMEM per TensorCore
        min_steps = 8                    # 2 TCs -> keep >= ~4 steps per core
    elif any(g in kind for g in ("v6", "v5", "v4", "tpu6", "tpu5", "tpu4")):
        vmem_cap = 128 * 1024 * 1024     # v5e / v6e: 128 MiB
        min_steps = 4                    # single TC -> pipeline depth only
    else:
        vmem_cap = 64 * 1024 * 1024      # unknown generation: be conservative
        min_steps = 8
    try:                                  # refine if the query API is present
        info = pltpu.get_tpu_info()
        vmem_cap = int(getattr(info, "vmem_capacity_bytes", vmem_cap))
    except Exception:
        pass
    return vmem_cap, min_steps


def _choose_block_rows(n, c, itemsize, vmem_limit):
    """Rows per grid step: as large as ~half the VMEM budget allows."""
    c_lanes = _round_up(c, 128)
    # Per-row VMEM cost of one grid step:
    #   2 double-buffered native-dtype logits buffers  (lane-padded to 128)
    # + ~4 live f32 (TM, C) temporaries (upcast logits, e, mask products, ...)
    # + 2 double-buffered (TM, 1) int32 target buffers (lane-padded to 128)
    per_row = 2 * c_lanes * itemsize + 4 * c_lanes * 4 + 2 * 128 * 4
    budget = max(8 * per_row, vmem_limit // 2)
    tm = budget // per_row
    # No benefit past ~8 MiB of logits HBM traffic per grid step.
    tm = min(tm, (8 * 1024 * 1024) // max(1, c * itemsize))
    return max(8, (tm // 8) * 8)


def _focal_loss_kernel(gamma, n_valid, use_alpha,
                       logits_ref, tgt_ref, alpha_ref, out_ref):
    # logits_ref : (TM, C)     native dtype (f32 / bf16)
    # tgt_ref    : (TM, 1)     int32 class labels
    # alpha_ref  : (1, C)      f32 per-class weights
    # out_ref    : (1, 8, 128) f32 -- per-tile partial sum, lane-broadcast
    logits = logits_ref[...].astype(jnp.float32)            # (TM, C)
    tgt = tgt_ref[...]                                       # (TM, 1)
    rows, c = logits.shape

    # one-hot(target) via iota compare (gather-free on TPU)
    col = jax.lax.broadcasted_iota(jnp.int32, (rows, c), 1)
    mask = col == tgt                                        # (TM, C) bool

    # cross-entropy per sample: logsumexp(logits) - logits[target]
    m = jnp.max(logits, axis=-1, keepdims=True)              # (TM, 1)
    e = jnp.exp(logits - m)                                   # (TM, C)
    sumexp = jnp.sum(e, axis=-1, keepdims=True)               # (TM, 1)
    lse = m + jnp.log(sumexp)                                 # (TM, 1)
    picked = jnp.sum(jnp.where(mask, logits, 0.0),
                     axis=-1, keepdims=True)                  # (TM, 1)
    ce = lse - picked                                         # (TM, 1)

    # pt = softmax(logits)[target]  (== exp(-ce)), reusing e: no extra EUP exp
    p_tgt = jnp.sum(jnp.where(mask, e, 0.0), axis=-1, keepdims=True)
    pt = p_tgt / sumexp                                       # (TM, 1)

    # optional alpha gather: at = alpha[target]; pt stays unweighted (matches
    # the reference module, where pt is computed before alpha is applied)
    if use_alpha:
        at = jnp.sum(jnp.where(mask, alpha_ref[...], 0.0),
                     axis=-1, keepdims=True)                  # (TM, 1)
        ce_w = at * ce
    else:
        ce_w = ce

    # focal modulation (1 - pt)^gamma: integer power -> VPU multiplies,
    # clamp to avoid log-of-negative when pt exceeds 1 by a few ULPs.
    q = jnp.maximum(1.0 - pt, 0.0)
    if float(gamma) == int(gamma):
        mod = jax.lax.integer_pow(q, int(gamma))
    else:
        mod = q ** jnp.float32(gamma)
    focal = mod * ce_w                                        # (TM, 1)

    # mask out rows past N (ragged / garbage rows of the partial last block);
    # jnp.where's false branch also stops any NaN from garbage rows leaking in
    row0 = pl.program_id(0) * rows
    ridx = row0 + jax.lax.broadcasted_iota(jnp.int32, (rows, 1), 0)
    focal = jnp.where(ridx < n_valid, focal, 0.0)

    # lane-dense partial-sum block (unmasked store); wrapper reads [.., 0, 0]
    out_ref[...] = jnp.broadcast_to(jnp.sum(focal), (1, 8, 128))


def focal_loss(logits, target, alpha=None, gamma=2, block_rows=None):
    """Pallas TPU implementation of FocalLoss.forward.

    logits : (N, C) float array (f32 or bf16; DMA'd in native dtype)
    target : (N,)   int array of class indices
    alpha  : optional (C,) float array of per-class weights
    gamma  : focal exponent (int or float)
    """
    n, c = logits.shape
    tgt2d = target.astype(jnp.int32).reshape(n, 1)
    if alpha is None:
        alpha_row = jnp.ones((1, c), jnp.float32)
        use_alpha = False
    else:
        alpha_row = jnp.asarray(alpha, jnp.float32).reshape(1, c)
        use_alpha = True

    itemsize = jnp.dtype(logits.dtype).itemsize
    vmem_cap, min_steps = _tpu_generation_params()
    vmem_limit = min(int(vmem_cap) * 3 // 4, 100 * 1024 * 1024)

    if block_rows is None:
        tm = _choose_block_rows(n, c, itemsize, vmem_limit)
    else:
        tm = max(8, (int(block_rows) // 8) * 8)
    if n >= 8:
        tm = min(tm, (n // 8) * 8)       # keep the block inside the array
    if block_rows is None:
        # keep enough grid steps to fill the pipeline / both v7x TensorCores
        while tm > 1024 and pl.cdiv(n, tm) < min_steps:
            tm = max(1024, ((tm // 2) // 8) * 8)

    # No batch padding: the last block may be partial; OOB rows read garbage
    # and are zeroed by the `ridx < n` mask inside the kernel.
    num_tiles = pl.cdiv(n, tm)

    kernel = functools.partial(_focal_loss_kernel, gamma, n, use_alpha)

    partials = pl.pallas_call(
        kernel,
        out_shape=jax.ShapeDtypeStruct((num_tiles, 8, 128), jnp.float32),
        grid=(num_tiles,),
        in_specs=[
            pl.BlockSpec((tm, c), lambda i: (i, 0)),   # logits tile (native dtype)
            pl.BlockSpec((tm, 1), lambda i: (i, 0)),   # targets tile
            pl.BlockSpec((1, c), lambda i: (0, 0)),    # alpha row (constant)
        ],
        out_specs=pl.BlockSpec((1, 8, 128), lambda i: (i, 0, 0)),
        compiler_params=pltpu.CompilerParams(
            dimension_semantics=("parallel",),
            vmem_limit_bytes=vmem_limit,
        ),
    )(logits, tgt2d, alpha_row)

    return jnp.sum(partials[:, 0, 0]) / n


def focal_loss_ref(logits, target, alpha=None, gamma=2):
    """Plain-JAX reference mirroring the PyTorch module."""
    logits = logits.astype(jnp.float32)
    lse = jax.scipy.special.logsumexp(logits, axis=-1)
    picked = jnp.take_along_axis(logits, target[:, None], axis=-1)[:, 0]
    ce = lse - picked
    pt = jnp.exp(-ce)
    if alpha is not None:
        ce = alpha.astype(jnp.float32)[target] * ce
    return jnp.mean(((1.0 - pt) ** gamma) * ce)


if __name__ == "__main__":
    key = jax.random.PRNGKey(0)
    k1, k2, k3, k4, k5, k6, k7 = jax.random.split(key, 7)

    # --- small shapes consistent with the module: batch=8, classes=32 ---
    N, C = 8, 32
    logits = jax.random.normal(k1, (N, C), jnp.float32)
    target = jax.random.randint(k2, (N,), 0, C, jnp.int32)
    alpha = 0.25 + 0.5 * jax.random.uniform(k3, (C,), jnp.float32)
    gamma = 2

    out = jax.block_until_ready(focal_loss(logits, target, alpha=alpha, gamma=gamma))
    ref = focal_loss_ref(logits, target, alpha=alpha, gamma=gamma)
    assert jnp.allclose(out, ref, rtol=1e-5, atol=1e-6), (out, ref)

    # alpha=None path (module default)
    out2 = jax.block_until_ready(focal_loss(logits, target, alpha=None, gamma=gamma))
    ref2 = focal_loss_ref(logits, target, alpha=None, gamma=gamma)
    assert jnp.allclose(out2, ref2, rtol=1e-5, atol=1e-6), (out2, ref2)

    # multi-tile grid + ragged (unpadded) last block
    N2 = 20
    logits2 = jax.random.normal(k4, (N2, C), jnp.float32)
    target2 = jax.random.randint(k5, (N2,), 0, C, jnp.int32)
    out3 = jax.block_until_ready(
        focal_loss(logits2, target2, alpha=alpha, gamma=gamma, block_rows=8))
    ref3 = focal_loss_ref(logits2, target2, alpha=alpha, gamma=gamma)
    assert jnp.allclose(out3, ref3, rtol=1e-5, atol=1e-6), (out3, ref3)

    # native bf16 logits path (halved HBM traffic; upcast happens in-kernel)
    logits_bf16 = logits.astype(jnp.bfloat16)
    out4 = jax.block_until_ready(
        focal_loss(logits_bf16, target, alpha=alpha, gamma=gamma))
    ref4 = focal_loss_ref(logits_bf16, target, alpha=alpha, gamma=gamma)
    assert jnp.allclose(out4, ref4, rtol=1e-4, atol=1e-5), (out4, ref4)

    # larger ragged batch exercising the auto-chosen tile, the min-grid-steps
    # heuristic and the masked partial last block (N % TM != 0, no padding)
    N3, C3 = 9001, 16
    logits3 = jax.random.normal(k6, (N3, C3), jnp.float32)
    target3 = jax.random.randint(k7, (N3,), 0, C3, jnp.int32)
    alpha3 = 0.25 + 0.5 * jax.random.uniform(k3, (C3,), jnp.float32)
    out5 = jax.block_until_ready(
        focal_loss(logits3, target3, alpha=alpha3, gamma=gamma))
    ref5 = focal_loss_ref(logits3, target3, alpha=alpha3, gamma=gamma)
    # cross-tile f32 summation order differs from jnp.mean -> slightly looser tol
    assert jnp.allclose(out5, ref5, rtol=1e-4, atol=1e-6), (out5, ref5)

    print("KERNEL_OK")
</pallas_src>

<mosaic_0001>
module attributes {stable_mosaic.version = 11 : i64} {
  func.func @_focal_loss_kernel(%arg0: i32, %arg1: memref<8x32xf32, #tpu.memory_space<vmem>>, %arg2: memref<8x1xi32, #tpu.memory_space<vmem>>, %arg3: memref<1x32xf32, #tpu.memory_space<vmem>>, %arg4: memref<1x8x128xf32, #tpu.memory_space<vmem>>) attributes {dimension_semantics = [#tpu.dimension_semantics<parallel>], iteration_bounds = array<i64: 1>, scalar_prefetch = 0 : i64, scratch_operands = 0 : i64, tpu.core_type = #tpu.core_type<tc>, window_params = [{transform_indices = @transform_0, window_bounds = array<i64: 8, 32>}, {transform_indices = @transform_1, window_bounds = array<i64: 8, 1>}, {pipeline_mode = #tpu.pipeline_mode<synchronous>, transform_indices = @transform_2, window_bounds = array<i64: 1, 32>}, {transform_indices = @transform_3, window_bounds = array<i64: 1, 8, 128>}]} {
    %c0 = arith.constant 0 : index
    %c0_0 = arith.constant 0 : index
    %0 = vector.load %arg1[%c0, %c0_0] : memref<8x32xf32, #tpu.memory_space<vmem>>, vector<8x32xf32>
    %c0_1 = arith.constant 0 : index
    %c0_2 = arith.constant 0 : index
    %1 = vector.load %arg2[%c0_1, %c0_2] : memref<8x1xi32, #tpu.memory_space<vmem>>, vector<8x1xi32>
    %2 = tpu.iota {dimensions = array<i32: 1>} : vector<8x32xi32>
    %3 = vector.broadcast %1 : vector<8x1xi32> to vector<8x32xi32>
    %4 = arith.cmpi eq, %2, %3 : vector<8x32xi32>
    %cst = arith.constant dense<0xFF800000> : vector<8xf32>
    %5 = vector.multi_reduction <maximumf>, %0, %cst [1] : vector<8x32xf32> to vector<8xf32>
    %6 = vector.shape_cast %5 : vector<8xf32> to vector<8x1xf32>
    %7 = vector.broadcast %6 : vector<8x1xf32> to vector<8x32xf32>
    %8 = arith.subf %0, %7 : vector<8x32xf32>
    %9 = math.exp %8 : vector<8x32xf32>
    %cst_3 = arith.constant dense<0.000000e+00> : vector<8xf32>
    %10 = vector.multi_reduction <add>, %9, %cst_3 [1] : vector<8x32xf32> to vector<8xf32>
    %11 = vector.shape_cast %10 : vector<8xf32> to vector<8x1xf32>
    %12 = math.log %11 : vector<8x1xf32>
    %13 = arith.addf %6, %12 : vector<8x1xf32>
    %cst_4 = arith.constant 0.000000e+00 : f32
    %14 = vector.broadcast %cst_4 : f32 to vector<8x32xf32>
    %15 = arith.select %4, %0, %14 : vector<8x32xi1>, vector<8x32xf32>
    %cst_5 = arith.constant dense<0.000000e+00> : vector<8xf32>
    %16 = vector.multi_reduction <add>, %15, %cst_5 [1] : vector<8x32xf32> to vector<8xf32>
    %17 = vector.shape_cast %16 : vector<8xf32> to vector<8x1xf32>
    %18 = arith.subf %13, %17 : vector<8x1xf32>
    %cst_6 = arith.constant 0.000000e+00 : f32
    %19 = vector.broadcast %cst_6 : f32 to vector<8x32xf32>
    %20 = arith.select %4, %9, %19 : vector<8x32xi1>, vector<8x32xf32>
    %cst_7 = arith.constant dense<0.000000e+00> : vector<8xf32>
    %21 = vector.multi_reduction <add>, %20, %cst_7 [1] : vector<8x32xf32> to vector<8xf32>
    %22 = vector.shape_cast %21 : vector<8xf32> to vector<8x1xf32>
    %23 = arith.divf %22, %11 : vector<8x1xf32>
    %c0_8 = arith.constant 0 : index
    %c0_9 = arith.constant 0 : index
    %24 = vector.load %arg3[%c0_8, %c0_9] : memref<1x32xf32, #tpu.memory_space<vmem>>, vector<1x32xf32>
    %cst_10 = arith.constant 0.000000e+00 : f32
    %25 = vector.shape_cast %24 : vector<1x32xf32> to vector<1x32xf32>
    %26 = vector.broadcast %25 : vector<1x32xf32> to vector<8x32xf32>
    %27 = vector.broadcast %cst_10 : f32 to vector<8x32xf32>
    %28 = arith.select %4, %26, %27 : vector<8x32xi1>, vector<8x32xf32>
    %cst_11 = arith.constant dense<0.000000e+00> : vector<8xf32>
    %29 = vector.multi_reduction <add>, %28, %cst_11 [1] : vector<8x32xf32> to vector<8xf32>
    %30 = vector.shape_cast %29 : vector<8xf32> to vector<8x1xf32>
    %31 = arith.mulf %30, %18 : vector<8x1xf32>
    %cst_12 = arith.constant 1.000000e+00 : f32
    %32 = vector.broadcast %cst_12 : f32 to vector<8x1xf32>
    %33 = arith.subf %32, %23 : vector<8x1xf32>
    %cst_13 = arith.constant 0.000000e+00 : f32
    %34 = vector.broadcast %cst_13 : f32 to vector<8x1xf32>
    %35 = arith.maximumf %33, %34 : vector<8x1xf32>
    %36 = arith.mulf %35, %35 : vector<8x1xf32>
    %37 = arith.mulf %36, %31 : vector<8x1xf32>
    %c8_i32 = arith.constant 8 : i32
    %38 = arith.muli %arg0, %c8_i32 : i32
    %39 = tpu.iota {dimensions = array<i32: 0>} : vector<8x1xi32>
    %40 = vector.broadcast %38 : i32 to vector<8x1xi32>
    %41 = arith.addi %40, %39 : vector<8x1xi32>
    %c8_i32_14 = arith.constant 8 : i32
    %42 = vector.broadcast %c8_i32_14 : i32 to vector<8x1xi32>
    %43 = arith.cmpi slt, %41, %42 : vector<8x1xi32>
    %cst_15 = arith.constant 0.000000e+00 : f32
    %44 = vector.broadcast %cst_15 : f32 to vector<8x1xf32>
    %45 = arith.select %43, %37, %44 : vector<8x1xi1>, vector<8x1xf32>
    %46 = vector.shape_cast %45 : vector<8x1xf32> to vector<1x8x1xf32>
    %cst_16 = arith.constant dense<0.000000e+00> : vector<1xf32>
    %47 = vector.multi_reduction <add>, %46, %cst_16 [1, 2] : vector<1x8x1xf32> to vector<1xf32>
    %48 = vector.shape_cast %47 : vector<1xf32> to vector<1x1x1xf32>
    %49 = vector.extract %48[0, 0, 0] : f32 from vector<1x1x1xf32>
    %50 = vector.broadcast %49 : f32 to vector<1x8x128xf32>
    %c0_17 = arith.constant 0 : index
    %c0_18 = arith.constant 0 : index
    %c0_19 = arith.constant 0 : index
    %51 = vector.load %arg4[%c0_17, %c0_18, %c0_19] : memref<1x8x128xf32, #tpu.memory_space<vmem>>, vector<1x8x128xf32>
    tpu.vector_store %arg4[%c0_17, %c0_18, %c0_19], %50 {strides = array<i32>} : memref<1x8x128xf32, #tpu.memory_space<vmem>>, vector<1x8x128xf32>,
    return
  }
  func.func @transform_0(%arg0: i32) -> (i32, i32) {
    %c0_i32 = arith.constant 0 : i32
    %c0_i32_0 = arith.constant 0 : i32
    return %arg0, %c0_i32 : i32, i32
  }
  func.func @transform_1(%arg0: i32) -> (i32, i32) {
    %c0_i32 = arith.constant 0 : i32
    %c0_i32_0 = arith.constant 0 : i32
    return %arg0, %c0_i32 : i32, i32
  }
  func.func @transform_2(%arg0: i32) -> (i32, i32) {
    %c0_i32 = arith.constant 0 : i32
    %c0_i32_0 = arith.constant 0 : i32
    %c0_i32_1 = arith.constant 0 : i32
    return %c0_i32, %c0_i32_0 : i32, i32
  }
  func.func @transform_3(%arg0: i32) -> (i32, i32, i32) {
    %c0_i32 = arith.constant 0 : i32
    %c0_i32_0 = arith.constant 0 : i32
    %c0_i32_1 = arith.constant 0 : i32
    return %arg0, %c0_i32, %c0_i32_0 : i32, i32, i32
  }
}

</mosaic_0001>

<bundles_post_ra>
// kernel: tpu_custom_call.1
= control target key start
LH: loop header
LB: loop body
LE: loop exit
PB: predicated region body
PF: predicated region fallthrough
CT: control target
= control target key end

     0   :  { %vm23_vm0 = vcmask 261120   ;;  %s170_s0 = inlined_call_operand.vmem [shape: f32[8,32], index: 0, kind: input, shape index: {}]   ;;  %s171_s1 = inlined_call_operand.vmem [shape: s32[8,1], index: 1, kind: input, shape index: {}]   ;;  %s172_s2 = inlined_call_operand.vmem [shape: f32[1,32], index: 2, kind: input, shape index: {}]   ;;  %s173_s3 = inlined_call_operand.hbm [shape: f32[1,8,128], index: 3, kind: output, shape index: {}]  }
   0x1   :  { %v15_v0 = vld [vmem:[%s170_s0] sm:$0xff] }
   0x2   :  { %8 = vsyncpa [#allocation3], 0  ;;  %v24_v1 = vsel %vm23_vm0, %v15_v0, -inf  ;;  %v131_v2 = vmov 0   ;;  %v16_v3 = vld [vmem:[%s171_s1] sm:$0xff]  ;;  %v17_v7 = vlaneseq  ;;  %vm70_vm2 = vcmask 7168  }
   0x3   :  { %102 = vset.pattern.permute.xlu0 %v131_v2  ;;  %v97_v15 = vld [vmem:[%s172_s2] ss:$0 sm:$0xff]  ;;  %s132_s1 = smov [#allocation2]  }
   0x4   :  { %25 = vmax.xlane.f32.xlu0 %v24_v1  ;;  %v18_v8 = vand.u32 127, %v17_v7  ;;  %s89_s2 = sshll.u32 %s132_s1, 4  ;;  %s90_s2 = int_to_ptr.vmem [resolvable:$true] %s89_s2 }
   0x5   :  { %s109_s18 = scalar_lea.vmem %s90_s2, 128  ;;  %p114_p1 = scmp.lt.s32.totalorder %s90_s2, %s90_s2 }
   0x6   :  { %p110_p0 = scmp.ne.s32.totalorder %s90_s2, %s109_s18  ;;  %p115_p2 = scmp.lt.s32.totalorder %s109_s18, %s109_s18 }
   0x8   :  { %p116_p3 = por %p115_p2, %p114_p1 }
   0xa   :  { %p117_p4 = pnand %p116_p3, %p110_p0 }
  0x1a   :  { %20 = vperm.xlu0 %102, %v16_v3  }
  0x8d   :  { %v26_v4 = vpop.xlane.xlu0 %25 }
  0x8e   :  { %v27_v5 = vsub.f32 %v15_v0, %v26_v4 }
  0x90   :  { %v28_v6 = vmul.f32 1.442695, %v27_v5 }
  0x92   :  { %103 = vpow2.f32 %v28_v6 }
  0x95   :  { %v21_v9 = vpop.permute.xlu0 %20 }
  0x96   :  { %vm22_vm1 = vcmp.eq.s32.totalorder %v18_v8, %v21_v9 }
  0x97   :  { %v36_v13 = vsel %vm22_vm1, %v15_v0, 0.0  ;;  %v54_v17 = vsel %vm22_vm1, %v97_v15, 0.0 }
  0x98   :  { %v37_v16 = vsel %vm23_vm0, %v36_v13, 0.0  ;;  %v55_v18 = vsel %vm23_vm0, %v54_v17, 0.0 }
  0x9f   :  { %v104_v10 = vpop.eup %103 }
  0xa0   :  { %v30_v11 = vsel %vm23_vm0, %v104_v10, 0.0  ;;  %v41_v12 = vsel %vm22_vm1, %v104_v10, 0.0 }
  0xa1   :  { %31 = vadd.xlane.f32.xlu1 %v30_v11  ;;  %v42_v14 = vsel %vm23_vm0, %v41_v12, 0.0 }
  0xa5   :  { %43 = vadd.xlane.f32.xlu1 %v42_v14 }
  0xa9   :  { %38 = vadd.xlane.f32.xlu1 %v37_v16 }
  0xad   :  { %56 = vadd.xlane.f32.xlu1 %v55_v18 }
 0x12a   :  { %v32_v19 = vpop.xlane.xlu1 %31 }
 0x12b   :  { %105 = vlog2.f32 %v32_v19 }
 0x12c   :  { %107 = vrcp.f32 %v32_v19 }
 0x12e   :  { %v44_v20 = vpop.xlane.xlu1 %43 }
 0x132   :  { %v39_v22 = vpop.xlane.xlu1 %38 }
 0x136   :  { %v57_v30 = vpop.xlane.xlu1 %56 }
 0x138   :  { %v106_v21 = vpop.eup %105 }
 0x139   :  { %v108_v23 = vpop.eup %107  ;;  %v34_v24 = vmul.f32 0.6931472, %v106_v21 }
 0x13a   :  { %v46_v25 = vmul.f32 %v108_v23, %v44_v20 }
 0x13b   :  { %v35_v26 = vadd.f32 %v34_v24, %v26_v4 }
 0x13c   :  { %v59_v27 = vsub.f32 1.0, %v46_v25 }
 0x13d   :  { %v40_v28 = vsub.f32 %v35_v26, %v39_v22 }
 0x13e   :  { %v60_v29 = vmax.f32 %v59_v27, 0.0 }
 0x13f   :  { %v58_v31 = vmul.f32 %v57_v30, %v40_v28 }
 0x140   :  { %v61_v32 = vmul.f32 %v60_v29, %v60_v29 }
 0x142   :  { %v62_v33 = vmul.f32 %v61_v32, %v58_v31 }
 0x144   :  { %v71_v34 = vsel %vm70_vm2, %v62_v33, 0.0 }
 0x145   :  { %72 = vadd.xlane.f32.xlu1 %v71_v34 }
 0x1ce   :  { %v73_v35 = vpop.xlane.xlu1 %72 }
 0x1cf   :  { %v74_v36 = vrot.slane %v73_v35, 4 }
 0x1d1   :  { %v75_v37 = vadd.f32 %v74_v36, %v73_v35 }
 0x1d3   :  { %v76_v38 = vrot.slane %v75_v37, 2 }
 0x1d5   :  { %v77_v39 = vadd.f32 %v76_v38, %v75_v37 }
 0x1d7   :  { %v78_v40 = vrot.slane %v77_v39, 1 }
 0x1d9   :  { %v79_v41 = vadd.f32 %v78_v40, %v77_v39 }
 0x1db   :  { %98 = vpush %v79_v41 }
 0x20c   :  { %s99_s17 = spop %98 }
 0x20d   :  { %v81_v42 = vstv %s99_s17 }
 0x20e   :  { %82 = vst [vmem:[#allocation2] sm:$0xff] %v81_v42 }
 0x20f   :  { %120 = shalt.err (!%p117_p4)
}
 0x210   :  { %92 = dma.vmem_to_hbm [thread:$0]  %s90_s2, 128, %s173_s3, [#allocation3]  }
 0x211   :  { %129 = dma.done.wait [#allocation3], 128  }
 0x212   :  { %130 = vsyncadd [#allocation3], 4294967168 }
 0x213   :  { %96 = vsyncpa [#allocation3], 1 }

</bundles_post_ra>
